<compile_context>
chip_gen: v6e
topology: v6e:2x2x1
jax: 0.10.0
libtpu: 0.0.40
codegen_flags: <defaults>
</compile_context>

<pallas_src>
import math
import functools

import jax
import jax.numpy as jnp
from jax import lax
from jax.experimental import pallas as pl
from jax.experimental.pallas import tpu as pltpu


def _pe_kernel(seed_ref, x_ref, pe_ref, o_ref, *, p, training, tile_s):
    """seed_ref: SMEM int32[1]; x_ref: (TS,B,D); pe_ref: (TS,1,D); o_ref: (TS,B,D)."""
    y = x_ref[...] + pe_ref[...]  # broadcast pe over the batch axis

    if training and p > 0.0:
        ts, b, d = x_ref.shape
        shape = (ts, b, d)
        # Globally unique per-element counter (unique across grid tiles too).
        s_ids = lax.broadcasted_iota(jnp.int32, shape, 0)
        b_ids = lax.broadcasted_iota(jnp.int32, shape, 1)
        d_ids = lax.broadcasted_iota(jnp.int32, shape, 2)
        tile_off = pl.program_id(0) * (tile_s * b * d)
        counter = tile_off + s_ids * (b * d) + b_ids * d + d_ids

        # Counter-based hash PRNG: mix seed into the counter, then murmur3
        # 32-bit finalizer for avalanche.  Pure uint32 VPU ops.
        seed = seed_ref[0].astype(jnp.uint32)
        h = counter.astype(jnp.uint32) ^ (seed * jnp.uint32(0x9E3779B9))
        h = h ^ (h >> jnp.uint32(16))
        h = h * jnp.uint32(0x85EBCA6B)
        h = h ^ (h >> jnp.uint32(13))
        h = h * jnp.uint32(0xC2B2AE35)
        h = h ^ (h >> jnp.uint32(16))

        # Integer-domain keep test: drop iff h < p * 2^32  (drop prob ~= p).
        thr = min(int(round(p * float(1 << 32))), (1 << 32) - 1)
        keep = h >= jnp.uint32(thr)
        scale = jnp.asarray(1.0 / (1.0 - p), dtype=y.dtype)
        y = jnp.where(keep, y * scale, jnp.zeros_like(y))

    o_ref[...] = y.astype(o_ref.dtype)


def make_pe_table(max_len, d_model, dtype=jnp.float32):
    """Deterministic sinusoidal table, shape [max_len, 1, d_model]."""
    position = jnp.arange(0, max_len, dtype=jnp.float32)[:, None]          # [L,1]
    div_term = jnp.exp(jnp.arange(0, d_model, 2, dtype=jnp.float32)
                       * (-math.log(10000.0) / d_model))                   # [D/2]
    pe = jnp.zeros((max_len, d_model), dtype=jnp.float32)
    pe = pe.at[:, 0::2].set(jnp.sin(position * div_term))
    pe = pe.at[:, 1::2].set(jnp.cos(position * div_term))
    return pe[:, None, :].astype(dtype)                                    # [L,1,D]


def positional_encoding(x, pe_full, *, p=0.1, training=False, seed=0):
    """x: [S, B, D]; returns [S, B, D] with x + pe (+ inverted dropout if training)."""
    S, B, D = x.shape
    pe = pe_full[:S].astype(x.dtype)  # [S, 1, D]
    seed_arr = jnp.asarray([seed], dtype=jnp.int32)

    # Sequence tile sized so each x/out tile is <= ~2 MiB: with double
    # buffering of x, pe and out that is ~8-9 MiB of scoped VMEM -> fits the
    # default limit on v5e/v6e/v7x, and sits at the measured tile-size sweet
    # spot for mem-bound elementwise kernels.
    itemsize = jnp.dtype(x.dtype).itemsize
    bytes_per_seq_row = max(1, B * D * itemsize)
    tile_s = max(1, min(S, (2 * 1024 * 1024) // bytes_per_seq_row))
    grid = (pl.cdiv(S, tile_s),)

    kernel = functools.partial(
        _pe_kernel, p=float(p), training=bool(training), tile_s=int(tile_s)
    )

    cost = pl.CostEstimate(
        flops=S * B * D,
        transcendentals=0,
        bytes_accessed=(2 * S * B * D + S * D) * itemsize,
    )

    return pl.pallas_call(
        kernel,
        out_shape=jax.ShapeDtypeStruct((S, B, D), x.dtype),
        grid_spec=pltpu.PrefetchScalarGridSpec(
            num_scalar_prefetch=1,
            grid=grid,
            in_specs=[
                pl.BlockSpec((tile_s, B, D), lambda i, seed: (i, 0, 0)),
                pl.BlockSpec((tile_s, 1, D), lambda i, seed: (i, 0, 0)),
            ],
            out_specs=pl.BlockSpec((tile_s, B, D), lambda i, seed: (i, 0, 0)),
        ),
        compiler_params=pltpu.CompilerParams(
            dimension_semantics=("parallel",),  # elementwise: shards across v7x's 2 TCs
        ),
        cost_estimate=cost,
    )(seed_arr, x, pe)


if __name__ == "__main__":
    # Small shapes consistent with the module's forward: x: [seq_len, batch, d_model]
    seq_len, batch, d_model = 8, 2, 32
    max_len = 64  # small synthetic max_len (module default is 5000)
    p = 0.1

    key = jax.random.PRNGKey(0)
    x = jax.random.normal(key, (seq_len, batch, d_model), dtype=jnp.float32)

    pe_full = make_pe_table(max_len, d_model)
    ref = x + pe_full[:seq_len]

    # Eval mode (dropout is identity): check against plain-JAX reference.
    out_eval = positional_encoding(x, pe_full, p=p, training=False)
    out_eval = jax.block_until_ready(out_eval)
    assert out_eval.shape == x.shape
    assert jnp.allclose(out_eval, ref, atol=1e-6, rtol=1e-6), "mismatch vs reference"

    # Training mode: inverted-dropout semantics (elements are 0 or ref/(1-p)).
    out_train = positional_encoding(x, pe_full, p=p, training=True, seed=1234)
    out_train = jax.block_until_ready(out_train)
    assert out_train.shape == x.shape
    dropped = out_train == 0.0
    drop_frac = float(jnp.mean(dropped.astype(jnp.float32)))
    assert 0.0 < drop_frac < 0.5, f"implausible dropout fraction {drop_frac}"
    kept_ok = jnp.where(dropped, True,
                        jnp.isclose(out_train, ref / (1.0 - p), atol=1e-5, rtol=1e-5))
    assert bool(jnp.all(kept_ok)), "kept elements not scaled by 1/(1-p)"

    print("KERNEL_OK")
</pallas_src>

<mosaic_0001>
module attributes {stable_mosaic.version = 11 : i64} {
  func.func @_pe_kernel(%arg0: i32, %arg1: memref<1xi32, #tpu.memory_space<smem>>, %arg2: memref<8x2x32xf32, #tpu.memory_space<vmem>>, %arg3: memref<8x1x32xf32, #tpu.memory_space<vmem>>, %arg4: memref<8x2x32xf32, #tpu.memory_space<vmem>>) attributes {dimension_semantics = [#tpu.dimension_semantics<parallel>], iteration_bounds = array<i64: 1>, scalar_prefetch = 1 : i64, scratch_operands = 0 : i64, tpu.core_type = #tpu.core_type<tc>, window_params = [{transform_indices = @transform_0, window_bounds = array<i64: 8, 2, 32>}, {transform_indices = @transform_1, window_bounds = array<i64: 8, 1, 32>}, {transform_indices = @transform_2, window_bounds = array<i64: 8, 2, 32>}]} {
    %c0 = arith.constant 0 : index
    %c0_0 = arith.constant 0 : index
    %c0_1 = arith.constant 0 : index
    %0 = vector.load %arg2[%c0, %c0_0, %c0_1] : memref<8x2x32xf32, #tpu.memory_space<vmem>>, vector<8x2x32xf32>
    %c0_2 = arith.constant 0 : index
    %c0_3 = arith.constant 0 : index
    %c0_4 = arith.constant 0 : index
    %1 = vector.load %arg3[%c0_2, %c0_3, %c0_4] : memref<8x1x32xf32, #tpu.memory_space<vmem>>, vector<8x1x32xf32>
    %2 = vector.broadcast %1 : vector<8x1x32xf32> to vector<8x2x32xf32>
    %3 = arith.addf %0, %2 : vector<8x2x32xf32>
    %c0_5 = arith.constant 0 : index
    %c0_6 = arith.constant 0 : index
    %c0_7 = arith.constant 0 : index
    %4 = vector.load %arg4[%c0_5, %c0_6, %c0_7] : memref<8x2x32xf32, #tpu.memory_space<vmem>>, vector<8x2x32xf32>
    tpu.vector_store %arg4[%c0_5, %c0_6, %c0_7], %3 {strides = array<i32>} : memref<8x2x32xf32, #tpu.memory_space<vmem>>, vector<8x2x32xf32>,
    return
  }
  func.func @transform_0(%arg0: i32, %arg1: memref<1xi32, #tpu.memory_space<smem>>) -> (i32, i32, i32) {
    %c0_i32 = arith.constant 0 : i32
    %c0_i32_0 = arith.constant 0 : i32
    %c0_i32_1 = arith.constant 0 : i32
    return %arg0, %c0_i32, %c0_i32_0 : i32, i32, i32
  }
  func.func @transform_1(%arg0: i32, %arg1: memref<1xi32, #tpu.memory_space<smem>>) -> (i32, i32, i32) {
    %c0_i32 = arith.constant 0 : i32
    %c0_i32_0 = arith.constant 0 : i32
    %c0_i32_1 = arith.constant 0 : i32
    return %arg0, %c0_i32, %c0_i32_0 : i32, i32, i32
  }
  func.func @transform_2(%arg0: i32, %arg1: memref<1xi32, #tpu.memory_space<smem>>) -> (i32, i32, i32) {
    %c0_i32 = arith.constant 0 : i32
    %c0_i32_0 = arith.constant 0 : i32
    %c0_i32_1 = arith.constant 0 : i32
    return %arg0, %c0_i32, %c0_i32_0 : i32, i32, i32
  }
}

</mosaic_0001>

<bundles_post_ra>
// kernel: tpu_custom_call.1
= control target key start
LH: loop header
LB: loop body
LE: loop exit
PB: predicated region body
PF: predicated region fallthrough
CT: control target
= control target key end

     0   :  { %9 = vsyncpa [#allocation5], 0  ;;  %s275_s0 = inlined_call_operand.<no memory space> [shape: s32[1], index: 0, kind: input, shape index: {}]   ;;  %s276_s1 = inlined_call_operand.hbm [shape: f32[8,2,32], index: 1, kind: input, shape index: {}]   ;;  %s277_s2 = inlined_call_operand.hbm [shape: f32[8,1,32], index: 2, kind: input, shape index: {}]   ;;  %s278_s3 = inlined_call_operand.hbm [shape: f32[8,2,32], index: 3, kind: output, shape index: {}]  }
   0x1   :  { %10 = vsyncpa [#allocation8], 0 }
   0x2   :  { %11 = vsyncpa [#allocation6], 0  ;;  %s222_s12 = smov [#allocation4]  }
   0x3   :  { %s17_s13 = sshll.u32 %s222_s12, 4  ;;  %s18_s13 = int_to_ptr.vmem [resolvable:$true] %s17_s13 }
   0x4   :  { %s164_s14 = scalar_lea.vmem %s18_s13, 256  ;;  %p169_p1 = scmp.lt.s32.totalorder %s18_s13, %s18_s13 }
   0x5   :  { %p165_p0 = scmp.ne.s32.totalorder %s18_s13, %s164_s14  ;;  %p170_p2 = scmp.lt.s32.totalorder %s164_s14, %s164_s14 }
   0x7   :  { %p171_p3 = por %p170_p2, %p169_p1 }
   0x9   :  { %p172_p4 = pnand %p171_p3, %p165_p0 }
   0xb   :  { %175 = shalt.err (!%p172_p4)
}
   0xc   :  { %s223_s0 = smov 32   ;;  %s224_s15 = smov 2  }
   0xd   :  { %23 = dma.hbm_to_vmem [thread:$0]  %s276_s1, 256, %s18_s13, [#allocation5], %s223_s0, %s223_s0, %s224_s15  }
   0xe   :  { %s225_s18 = smov [#allocation7]  }
   0xf   :  { %s29_s19 = sshll.u32 %s225_s18, 4  ;;  %s30_s19 = int_to_ptr.vmem [resolvable:$true] %s29_s19 }
  0x10   :  { %s184_s20 = scalar_lea.vmem %s30_s19, 128  ;;  %p189_p6 = scmp.lt.s32.totalorder %s30_s19, %s30_s19 }
  0x11   :  { %p185_p5 = scmp.ne.s32.totalorder %s30_s19, %s184_s20  ;;  %p190_p7 = scmp.lt.s32.totalorder %s184_s20, %s184_s20 }
  0x13   :  { %p191_p8 = por %p190_p7, %p189_p6 }
  0x15   :  { %p192_p9 = pnand %p191_p8, %p185_p5 }
  0x17   :  { %195 = shalt.err (!%p192_p9)
}
  0x18   :  { %s226_s21 = smov 16   ;;  %s227_s22 = smov 1  }
  0x19   :  { %35 = dma.hbm_to_vmem [thread:$0]  %s277_s2, 128, %s30_s19, [#allocation8], %s226_s21, %s226_s21, %s227_s22  }
  0x1a   :  { %216 = dma.done.wait [#allocation5], 256  }
  0x1b   :  { %217 = vsyncadd [#allocation5], 4294967040 }
  0x1c   :  { %218 = dma.done.wait [#allocation8], 128  }
  0x1d   :  { %219 = vsyncadd [#allocation8], 4294967168  ;;  %vm114_vm0 = vcmask 254976   ;;  %s228_s1 = smov [#allocation9]   ;;  %v42_v0 = vld [vmem:[#allocation4] sm:$0x3] }
  0x1e   :  { %s258_s25 = sshll.u32 %s228_s1, 4  ;;  %v141_v1 = vld [vmem:[#allocation7] ss:$0 sm:$0xff]  ;;  %v43_v2 = vld [vmem:[#allocation4 + $0x2] sm:$0x3]  ;;  %s129_s25 = int_to_ptr.vmem [resolvable:$true] %s258_s25 }
  0x1f   :  { %v106_v3 = vadd.f32 %v141_v1, %v42_v0  ;;  %v142_v4 = vld [vmem:[#allocation7 + $0x1] ss:$0 sm:$0xff]  ;;  %v44_v5 = vld [vmem:[#allocation4 + $0x4] sm:$0x3]  ;;  %v143_v6 = vld [vmem:[#allocation7 + $0x2] ss:$0 sm:$0xff]  ;;  %p201_p11 = scmp.lt.s32.totalorder %s129_s25, %s129_s25 }
  0x20   :  { %v107_v7 = vadd.f32 %v142_v4, %v43_v2  ;;  %v108_v8 = vadd.f32 %v143_v6, %v44_v5  ;;  %v45_v9 = vld [vmem:[#allocation4 + $0x6] sm:$0x3]  ;;  %v144_v10 = vld [vmem:[#allocation7 + $0x3] ss:$0 sm:$0xff]  ;;  %v46_v11 = vld [vmem:[#allocation4 + $0x8] sm:$0x3] }
  0x21   :  { %115 = vst.msk [vmem:[#allocation9] sm:$0x3] %vm114_vm0, %v106_v3  ;;  %v109_v12 = vadd.f32 %v144_v10, %v45_v9  ;;  %v145_v13 = vld [vmem:[#allocation7 + $0x4] ss:$0 sm:$0xff]  ;;  %v47_v14 = vld [vmem:[#allocation4 + $0xa] sm:$0x3] }
  0x22   :  { %v146_v15 = vld [vmem:[#allocation7 + $0x5] ss:$0 sm:$0xff]  ;;  %116 = vst.msk [vmem:[#allocation9 + $0x2] sm:$0x3] %vm114_vm0, %v107_v7  ;;  %117 = vst.msk [vmem:[#allocation9 + $0x4] sm:$0x3] %vm114_vm0, %v108_v8  ;;  %v110_v16 = vadd.f32 %v145_v13, %v46_v11 }
  0x23   :  { %v111_v17 = vadd.f32 %v146_v15, %v47_v14  ;;  %v48_v18 = vld [vmem:[#allocation4 + $0xc] sm:$0x3]  ;;  %v147_v19 = vld [vmem:[#allocation7 + $0x6] ss:$0 sm:$0xff]  ;;  %v49_v20 = vld [vmem:[#allocation4 + $0xe] sm:$0x3] }
  0x24   :  { %118 = vst.msk [vmem:[#allocation9 + $0x6] sm:$0x3] %vm114_vm0, %v109_v12  ;;  %v112_v21 = vadd.f32 %v147_v19, %v48_v18  ;;  %v148_v22 = vld [vmem:[#allocation7 + $0x7] ss:$0 sm:$0xff]  ;;  %119 = vst.msk [vmem:[#allocation9 + $0x8] sm:$0x3] %vm114_vm0, %v110_v16 }
  0x25   :  { %120 = vst.msk [vmem:[#allocation9 + $0xa] sm:$0x3] %vm114_vm0, %v111_v17  ;;  %v113_v23 = vadd.f32 %v148_v22, %v49_v20  ;;  %s196_s2 = scalar_lea.vmem %s129_s25, 256 }
  0x26   :  { %121 = vst.msk [vmem:[#allocation9 + $0xc] sm:$0x3] %vm114_vm0, %v112_v21  ;;  %p197_p10 = scmp.ne.s32.totalorder %s129_s25, %s196_s2  ;;  %p202_p12 = scmp.lt.s32.totalorder %s196_s2, %s196_s2 }
  0x27   :  { %122 = vst.msk [vmem:[#allocation9 + $0xe] sm:$0x3] %vm114_vm0, %v113_v23 }
  0x28   :  { %p203_p13 = por %p202_p12, %p201_p11 }
  0x2a   :  { %p204_p0 = pnand %p203_p13, %p197_p10 }
  0x2c   :  { %207 = shalt.err (!%p204_p0)
}
  0x2d   :  { %134 = dma.vmem_to_hbm [thread:$0]  %s129_s25, 256, %s278_s3, [#allocation6], %s223_s0, %s223_s0, %s224_s15  }
  0x2e   :  { %220 = dma.done.wait [#allocation6], 256  }
  0x2f   :  { %221 = vsyncadd [#allocation6], 4294967040 }
  0x30   :  { %138 = vsyncpa [#allocation5], 1 }
  0x31   :  { %139 = vsyncpa [#allocation8], 1 }
  0x32   :  { %140 = vsyncpa [#allocation6], 1 }

</bundles_post_ra>
